<compile_context>
chip_gen: v7x
topology: tpu7x:2x2x1
jax: 0.10.0
libtpu: 0.0.40
codegen_flags: <defaults>
</compile_context>

<pallas_src>
import jax
import jax.numpy as jnp
from jax.experimental import pallas as pl
from jax.experimental.pallas import tpu as pltpu

FEATURE_LEN = 256
NUM_CLASSES = 4
BN_EPS = 1e-5
SMALL_OUT = NUM_CLASSES + 2          # packed [pred(4) | z(2)] output width

# Original module topology: (in, out) per Linear, in forward-use order.
LINEAR_DIMS = [
    (FEATURE_LEN, 200), (200, 100), (100, 20), (20, 2),      # enc_fc1..4
    (2, 20), (20, 100), (100, 200), (200, FEATURE_LEN),      # dec_fc1..4
    (2, 16), (16, NUM_CLASSES),                               # cf_fc1..2
]
BN_DIMS = [200, 100, 20, 2,      # enc_bn1..4
           20, 100, 200,         # dec_bn1..3
           16]                   # cf_bn1
# Linear index -> BatchNorm index that follows it (None = no BN).
LIN_TO_BN = [0, 1, 2, 3, 4, 5, 6, None, 7, None]

# After BN-folding and fusing linear 4 (dec_fc1) with linear 8 (cf_fc1):
#   L0..L3 = encoder, L4 = fused (2->36), L5..L7 = decoder tail, L8 = cf_fc2.
OUT_DIMS = [200, 100, 20, 2, 36, 100, 200, FEATURE_LEN, NUM_CLASSES]
N_LAYERS = len(OUT_DIMS)   # 9


# ----------------------------------------------------------------------------
# kernel
# ----------------------------------------------------------------------------
def ae_kernel(x_ref, *refs):
    """refs = w0..w8 (bf16, [in,out]), bias_pack (9,256 f32), x_out, packed(pred|z)."""
    w_refs = refs[:N_LAYERS]
    b_ref = refs[N_LAYERS]
    xo_ref = refs[N_LAYERS + 1]
    pz_ref = refs[N_LAYERS + 2]

    def lin(h, i):
        # bf16 x bf16 MXU matmul with f32 accumulation; bias is a static
        # prefix slice of row i of the packed bias slab.
        y = jnp.dot(h.astype(jnp.bfloat16), w_refs[i][...],
                    preferred_element_type=jnp.float32)
        return y + b_ref[i:i + 1, :OUT_DIMS[i]]

    h = x_ref[...]

    # ----- encoder -----  (dropout = identity, BN folded into W/b)
    h = jnp.tanh(lin(h, 0))
    h = jnp.tanh(lin(h, 1))
    h = jnp.tanh(lin(h, 2))
    z = jnp.tanh(lin(h, 3))                    # (TB, 2)

    # ----- fused dec_fc1 | cf_fc1 (both tanh(bn(lin(z)))) -----
    y = jnp.tanh(lin(z, 4))                    # (TB, 36)
    d = y[:, :20]                              # decoder branch
    c = y[:, 20:36]                            # classifier branch

    # ----- decoder tail -----
    d = jnp.tanh(lin(d, 5))
    d = jnp.tanh(lin(d, 6))
    xo_ref[...] = jnp.tanh(lin(d, 7)).astype(xo_ref.dtype)

    # ----- classifier head (no tanh on final layer) -----
    pred = lin(c, 8)                           # (TB, 4)

    # pack the two lane-narrow outputs into one block: [pred | z]
    pz_ref[...] = jnp.concatenate([pred, z], axis=1).astype(pz_ref.dtype)


# ----------------------------------------------------------------------------
# wrapper
# ----------------------------------------------------------------------------
def ae_forward(x, weights, bias_pack, *, tb=256):
    """x: [B, FEATURE_LEN] f32. weights: 9 bf16 [in,out] arrays (BN-folded,
    z-layers fused). bias_pack: (9, FEATURE_LEN) f32. Returns (x_out, pred, z)."""
    B = x.shape[0]
    tb = min(tb, B)                      # small batches: one full-batch block
    grid_b = pl.cdiv(B, tb)
    b_pad = grid_b * tb
    if b_pad != B:
        x = jnp.pad(x, ((0, b_pad - B), (0, 0)))

    def batch_spec(dim):
        return pl.BlockSpec((tb, dim), lambda i: (i, 0))

    def resident_spec(shape):
        # same block index every grid step -> stays resident in VMEM
        return pl.BlockSpec(shape, lambda i: (0, 0))

    in_specs = [batch_spec(FEATURE_LEN)]
    in_specs += [resident_spec(w.shape) for w in weights]
    in_specs += [resident_spec(bias_pack.shape)]

    out_shape = (
        jax.ShapeDtypeStruct((b_pad, FEATURE_LEN), jnp.float32),   # x_out
        jax.ShapeDtypeStruct((b_pad, SMALL_OUT), jnp.float32),     # [pred | z]
    )
    out_specs = (batch_spec(FEATURE_LEN), batch_spec(SMALL_OUT))

    x_out, pz = pl.pallas_call(
        ae_kernel,
        grid=(grid_b,),
        out_shape=out_shape,
        in_specs=in_specs,
        out_specs=out_specs,
        compiler_params=pltpu.CompilerParams(
            dimension_semantics=("parallel",)),   # megacore batch sharding (v7x)
    )(x, *weights, bias_pack)

    x_out = x_out[:B]
    pred = pz[:B, :NUM_CLASSES]
    z = pz[:B, NUM_CLASSES:NUM_CLASSES + 2]
    return x_out, pred, z


# ----------------------------------------------------------------------------
# parameter construction / preparation
# ----------------------------------------------------------------------------
def init_raw_params(key):
    """Raw per-layer params in PyTorch layout (but weights pre-transposed to
    [in,out]).  Linear: U(-1/sqrt(fan_in), 1/sqrt(fan_in)).  BatchNorm stats
    are randomized (not identity) so the BN-fold is actually exercised."""
    weights, biases = [], []
    for (fan_in, fan_out) in LINEAR_DIMS:
        key, kw, kb = jax.random.split(key, 3)
        bound = float(fan_in) ** -0.5
        w = jax.random.uniform(kw, (fan_in, fan_out), jnp.float32, -bound, bound)
        b = jax.random.uniform(kb, (1, fan_out), jnp.float32, -bound, bound)
        weights.append(w)
        biases.append(b)

    bn_params = []
    for dim in BN_DIMS:
        key, k1, k2, k3, k4 = jax.random.split(key, 5)
        gamma = jax.random.uniform(k1, (1, dim), jnp.float32, 0.5, 1.5)
        beta = 0.1 * jax.random.normal(k2, (1, dim), jnp.float32)
        mean = 0.1 * jax.random.normal(k3, (1, dim), jnp.float32)
        var = jax.random.uniform(k4, (1, dim), jnp.float32, 0.5, 1.5)
        bn_params.append((gamma, beta, mean, var))
    return weights, biases, bn_params


def fold_and_pack(weights, biases, bn_params):
    """Fold eval-mode BN into Linear, fuse the two z-consuming layers, cast
    weights to bf16, pack all biases into one (9, FEATURE_LEN) f32 slab."""
    fw, fb = [], []
    for i, (w, b) in enumerate(zip(weights, biases)):
        j = LIN_TO_BN[i]
        if j is not None:
            gamma, beta, mean, var = bn_params[j]
            scale = gamma / jnp.sqrt(var + BN_EPS)      # (1, out)
            shift = beta - mean * scale
            w = w * scale
            b = b * scale + shift
        fw.append(w)
        fb.append(b)

    # fuse dec_fc1 (idx 4) and cf_fc1 (idx 8): both consume z with K=2
    w_fused = jnp.concatenate([fw[4], fw[8]], axis=1)   # (2, 36)
    b_fused = jnp.concatenate([fb[4], fb[8]], axis=1)   # (1, 36)

    ws = [fw[0], fw[1], fw[2], fw[3], w_fused, fw[5], fw[6], fw[7], fw[9]]
    bs = [fb[0], fb[1], fb[2], fb[3], b_fused, fb[5], fb[6], fb[7], fb[9]]
    ws = [w.astype(jnp.bfloat16) for w in ws]

    bias_pack = jnp.zeros((N_LAYERS, FEATURE_LEN), jnp.float32)
    for i, b in enumerate(bs):
        bias_pack = bias_pack.at[i, :b.shape[1]].set(b[0])
    return ws, bias_pack


# ----------------------------------------------------------------------------
# references
# ----------------------------------------------------------------------------
def reference_prepared(x, ws, bias_pack):
    """Pure-JAX mirror of the kernel math (same folded bf16 weights)."""
    def lin(h, i):
        y = jnp.dot(h.astype(jnp.bfloat16), ws[i],
                    preferred_element_type=jnp.float32)
        return y + bias_pack[i:i + 1, :OUT_DIMS[i]]

    h = jnp.tanh(lin(x, 0))
    h = jnp.tanh(lin(h, 1))
    h = jnp.tanh(lin(h, 2))
    z = jnp.tanh(lin(h, 3))
    y = jnp.tanh(lin(z, 4))
    d, c = y[:, :20], y[:, 20:36]
    d = jnp.tanh(lin(d, 5))
    d = jnp.tanh(lin(d, 6))
    x_out = jnp.tanh(lin(d, 7))
    pred = lin(c, 8)
    return x_out, pred, z


def reference_f32(x, weights, biases, bn_params):
    """Original (unfolded, unfused) module semantics in full f32, eval mode."""
    def lin(h, i):
        return h @ weights[i] + biases[i]

    def bn(h, j):
        gamma, beta, mean, var = bn_params[j]
        return (h - mean) / jnp.sqrt(var + BN_EPS) * gamma + beta

    h = jnp.tanh(bn(lin(x, 0), 0))
    h = jnp.tanh(bn(lin(h, 1), 1))
    h = jnp.tanh(bn(lin(h, 2), 2))
    z = jnp.tanh(bn(lin(h, 3), 3))
    d = jnp.tanh(bn(lin(z, 4), 4))
    d = jnp.tanh(bn(lin(d, 5), 5))
    d = jnp.tanh(bn(lin(d, 6), 6))
    x_out = jnp.tanh(lin(d, 7))
    c = jnp.tanh(bn(lin(z, 8), 7))
    pred = lin(c, 9)
    return x_out, pred, z


# ----------------------------------------------------------------------------
if __name__ == "__main__":
    key = jax.random.PRNGKey(0)
    key, kx, kp = jax.random.split(key, 3)

    B = 8
    x = jax.random.normal(kx, (B, FEATURE_LEN), jnp.float32)
    weights, biases, bn_params = init_raw_params(kp)
    ws, bias_pack = fold_and_pack(weights, biases, bn_params)

    x_out, pred, z = ae_forward(x, ws, bias_pack)
    jax.block_until_ready((x_out, pred, z))

    assert x_out.shape == (B, FEATURE_LEN)
    assert pred.shape == (B, NUM_CLASSES)
    assert z.shape == (B, 2)

    # tight check: same folded / bf16 math in pure JAX
    r_xo, r_pred, r_z = reference_prepared(x, ws, bias_pack)
    assert jnp.allclose(x_out, r_xo, atol=5e-3)
    assert jnp.allclose(pred, r_pred, atol=5e-3)
    assert jnp.allclose(z, r_z, atol=5e-3)

    # loose check: original unfolded f32 module semantics (bf16 weight error)
    f_xo, f_pred, f_z = reference_f32(x, weights, biases, bn_params)
    assert jnp.allclose(x_out, f_xo, atol=1e-1)
    assert jnp.allclose(pred, f_pred, atol=1e-1)
    assert jnp.allclose(z, f_z, atol=1e-1)

    print("KERNEL_OK")
</pallas_src>

<mosaic_0001>
module attributes {stable_mosaic.version = 11 : i64} {
  func.func @ae_kernel(%arg0: i32, %arg1: memref<8x256xf32, #tpu.memory_space<vmem>>, %arg2: memref<256x200xbf16, #tpu.memory_space<vmem>>, %arg3: memref<200x100xbf16, #tpu.memory_space<vmem>>, %arg4: memref<100x20xbf16, #tpu.memory_space<vmem>>, %arg5: memref<20x2xbf16, #tpu.memory_space<vmem>>, %arg6: memref<2x36xbf16, #tpu.memory_space<vmem>>, %arg7: memref<20x100xbf16, #tpu.memory_space<vmem>>, %arg8: memref<100x200xbf16, #tpu.memory_space<vmem>>, %arg9: memref<200x256xbf16, #tpu.memory_space<vmem>>, %arg10: memref<16x4xbf16, #tpu.memory_space<vmem>>, %arg11: memref<9x256xf32, #tpu.memory_space<vmem>>, %arg12: memref<8x256xf32, #tpu.memory_space<vmem>>, %arg13: memref<8x6xf32, #tpu.memory_space<vmem>>) attributes {dimension_semantics = [#tpu.dimension_semantics<parallel>], iteration_bounds = array<i64: 1>, scalar_prefetch = 0 : i64, scratch_operands = 0 : i64, tpu.core_type = #tpu.core_type<tc>, window_params = [{transform_indices = @transform_0, window_bounds = array<i64: 8, 256>}, {pipeline_mode = #tpu.pipeline_mode<synchronous>, transform_indices = @transform_1, window_bounds = array<i64: 256, 200>}, {pipeline_mode = #tpu.pipeline_mode<synchronous>, transform_indices = @transform_2, window_bounds = array<i64: 200, 100>}, {pipeline_mode = #tpu.pipeline_mode<synchronous>, transform_indices = @transform_3, window_bounds = array<i64: 100, 20>}, {pipeline_mode = #tpu.pipeline_mode<synchronous>, transform_indices = @transform_4, window_bounds = array<i64: 20, 2>}, {pipeline_mode = #tpu.pipeline_mode<synchronous>, transform_indices = @transform_5, window_bounds = array<i64: 2, 36>}, {pipeline_mode = #tpu.pipeline_mode<synchronous>, transform_indices = @transform_6, window_bounds = array<i64: 20, 100>}, {pipeline_mode = #tpu.pipeline_mode<synchronous>, transform_indices = @transform_7, window_bounds = array<i64: 100, 200>}, {pipeline_mode = #tpu.pipeline_mode<synchronous>, transform_indices = @transform_8, window_bounds = array<i64: 200, 256>}, {pipeline_mode = #tpu.pipeline_mode<synchronous>, transform_indices = @transform_9, window_bounds = array<i64: 16, 4>}, {pipeline_mode = #tpu.pipeline_mode<synchronous>, transform_indices = @transform_10, window_bounds = array<i64: 9, 256>}, {transform_indices = @transform_11, window_bounds = array<i64: 8, 256>}, {transform_indices = @transform_12, window_bounds = array<i64: 8, 6>}]} {
    %c0 = arith.constant 0 : index
    %c0_0 = arith.constant 0 : index
    %0 = vector.load %arg1[%c0, %c0_0] : memref<8x256xf32, #tpu.memory_space<vmem>>, vector<8x256xf32>
    %1 = arith.truncf %0 : vector<8x256xf32> to vector<8x256xbf16>
    %c0_1 = arith.constant 0 : index
    %c0_2 = arith.constant 0 : index
    %2 = vector.load %arg2[%c0_1, %c0_2] : memref<256x200xbf16, #tpu.memory_space<vmem>>, vector<256x200xbf16>
    %cst = arith.constant dense<0.000000e+00> : vector<8x200xf32>
    %3 = tpu.matmul %1, %2, %cst {dimension_numbers = #tpu.dot_dimension_numbers<[1], [0], [0], [1], [0, 0, 1, 1], [], []>} : vector<8x256xbf16>, vector<256x200xbf16>, vector<8x200xf32> -> vector<8x200xf32>
    %c0_3 = arith.constant 0 : index
    %c0_4 = arith.constant 0 : index
    %4 = vector.load %arg11[%c0_3, %c0_4] : memref<9x256xf32, #tpu.memory_space<vmem>>, vector<1x200xf32>
    %5 = vector.broadcast %4 : vector<1x200xf32> to vector<8x200xf32>
    %6 = arith.addf %3, %5 : vector<8x200xf32>
    %7 = math.tanh %6 : vector<8x200xf32>
    %8 = arith.truncf %7 : vector<8x200xf32> to vector<8x200xbf16>
    %c0_5 = arith.constant 0 : index
    %c0_6 = arith.constant 0 : index
    %9 = vector.load %arg3[%c0_5, %c0_6] : memref<200x100xbf16, #tpu.memory_space<vmem>>, vector<200x100xbf16>
    %cst_7 = arith.constant dense<0.000000e+00> : vector<8x100xf32>
    %10 = tpu.matmul %8, %9, %cst_7 {dimension_numbers = #tpu.dot_dimension_numbers<[1], [0], [0], [1], [0, 0, 1, 1], [], []>} : vector<8x200xbf16>, vector<200x100xbf16>, vector<8x100xf32> -> vector<8x100xf32>
    %c1 = arith.constant 1 : index
    %c0_8 = arith.constant 0 : index
    %11 = vector.load %arg11[%c1, %c0_8] : memref<9x256xf32, #tpu.memory_space<vmem>>, vector<1x100xf32>
    %12 = vector.broadcast %11 : vector<1x100xf32> to vector<8x100xf32>
    %13 = arith.addf %10, %12 : vector<8x100xf32>
    %14 = math.tanh %13 : vector<8x100xf32>
    %15 = arith.truncf %14 : vector<8x100xf32> to vector<8x100xbf16>
    %c0_9 = arith.constant 0 : index
    %c0_10 = arith.constant 0 : index
    %16 = vector.load %arg4[%c0_9, %c0_10] : memref<100x20xbf16, #tpu.memory_space<vmem>>, vector<100x20xbf16>
    %cst_11 = arith.constant dense<0.000000e+00> : vector<8x20xf32>
    %17 = tpu.matmul %15, %16, %cst_11 {dimension_numbers = #tpu.dot_dimension_numbers<[1], [0], [0], [1], [0, 0, 1, 1], [], []>} : vector<8x100xbf16>, vector<100x20xbf16>, vector<8x20xf32> -> vector<8x20xf32>
    %c2 = arith.constant 2 : index
    %c0_12 = arith.constant 0 : index
    %18 = vector.load %arg11[%c2, %c0_12] : memref<9x256xf32, #tpu.memory_space<vmem>>, vector<1x20xf32>
    %19 = vector.broadcast %18 : vector<1x20xf32> to vector<8x20xf32>
    %20 = arith.addf %17, %19 : vector<8x20xf32>
    %21 = math.tanh %20 : vector<8x20xf32>
    %22 = arith.truncf %21 : vector<8x20xf32> to vector<8x20xbf16>
    %c0_13 = arith.constant 0 : index
    %c0_14 = arith.constant 0 : index
    %23 = vector.load %arg5[%c0_13, %c0_14] : memref<20x2xbf16, #tpu.memory_space<vmem>>, vector<20x2xbf16>
    %cst_15 = arith.constant dense<0.000000e+00> : vector<8x2xf32>
    %24 = tpu.matmul %22, %23, %cst_15 {dimension_numbers = #tpu.dot_dimension_numbers<[1], [0], [0], [1], [0, 0, 1, 1], [], []>} : vector<8x20xbf16>, vector<20x2xbf16>, vector<8x2xf32> -> vector<8x2xf32>
    %c3 = arith.constant 3 : index
    %c0_16 = arith.constant 0 : index
    %25 = vector.load %arg11[%c3, %c0_16] : memref<9x256xf32, #tpu.memory_space<vmem>>, vector<1x2xf32>
    %26 = vector.broadcast %25 : vector<1x2xf32> to vector<8x2xf32>
    %27 = arith.addf %24, %26 : vector<8x2xf32>
    %28 = math.tanh %27 : vector<8x2xf32>
    %29 = arith.truncf %28 : vector<8x2xf32> to vector<8x2xbf16>
    %c0_17 = arith.constant 0 : index
    %c0_18 = arith.constant 0 : index
    %30 = vector.load %arg6[%c0_17, %c0_18] : memref<2x36xbf16, #tpu.memory_space<vmem>>, vector<2x36xbf16>
    %cst_19 = arith.constant dense<0.000000e+00> : vector<8x36xf32>
    %31 = tpu.matmul %29, %30, %cst_19 {dimension_numbers = #tpu.dot_dimension_numbers<[1], [0], [0], [1], [0, 0, 1, 1], [], []>} : vector<8x2xbf16>, vector<2x36xbf16>, vector<8x36xf32> -> vector<8x36xf32>
    %c4 = arith.constant 4 : index
    %c0_20 = arith.constant 0 : index
    %32 = vector.load %arg11[%c4, %c0_20] : memref<9x256xf32, #tpu.memory_space<vmem>>, vector<1x36xf32>
    %33 = vector.broadcast %32 : vector<1x36xf32> to vector<8x36xf32>
    %34 = arith.addf %31, %33 : vector<8x36xf32>
    %35 = math.tanh %34 : vector<8x36xf32>
    %36 = vector.extract_strided_slice %35 {offsets = [0, 0], sizes = [8, 20], strides = [1, 1]} : vector<8x36xf32> to vector<8x20xf32>
    %37 = vector.extract_strided_slice %35 {offsets = [0, 20], sizes = [8, 16], strides = [1, 1]} : vector<8x36xf32> to vector<8x16xf32>
    %38 = arith.truncf %36 : vector<8x20xf32> to vector<8x20xbf16>
    %c0_21 = arith.constant 0 : index
    %c0_22 = arith.constant 0 : index
    %39 = vector.load %arg7[%c0_21, %c0_22] : memref<20x100xbf16, #tpu.memory_space<vmem>>, vector<20x100xbf16>
    %cst_23 = arith.constant dense<0.000000e+00> : vector<8x100xf32>
    %40 = tpu.matmul %38, %39, %cst_23 {dimension_numbers = #tpu.dot_dimension_numbers<[1], [0], [0], [1], [0, 0, 1, 1], [], []>} : vector<8x20xbf16>, vector<20x100xbf16>, vector<8x100xf32> -> vector<8x100xf32>
    %c5 = arith.constant 5 : index
    %c0_24 = arith.constant 0 : index
    %41 = vector.load %arg11[%c5, %c0_24] : memref<9x256xf32, #tpu.memory_space<vmem>>, vector<1x100xf32>
    %42 = vector.broadcast %41 : vector<1x100xf32> to vector<8x100xf32>
    %43 = arith.addf %40, %42 : vector<8x100xf32>
    %44 = math.tanh %43 : vector<8x100xf32>
    %45 = arith.truncf %44 : vector<8x100xf32> to vector<8x100xbf16>
    %c0_25 = arith.constant 0 : index
    %c0_26 = arith.constant 0 : index
    %46 = vector.load %arg8[%c0_25, %c0_26] : memref<100x200xbf16, #tpu.memory_space<vmem>>, vector<100x200xbf16>
    %cst_27 = arith.constant dense<0.000000e+00> : vector<8x200xf32>
    %47 = tpu.matmul %45, %46, %cst_27 {dimension_numbers = #tpu.dot_dimension_numbers<[1], [0], [0], [1], [0, 0, 1, 1], [], []>} : vector<8x100xbf16>, vector<100x200xbf16>, vector<8x200xf32> -> vector<8x200xf32>
    %c6 = arith.constant 6 : index
    %c0_28 = arith.constant 0 : index
    %48 = vector.load %arg11[%c6, %c0_28] : memref<9x256xf32, #tpu.memory_space<vmem>>, vector<1x200xf32>
    %49 = vector.broadcast %48 : vector<1x200xf32> to vector<8x200xf32>
    %50 = arith.addf %47, %49 : vector<8x200xf32>
    %51 = math.tanh %50 : vector<8x200xf32>
    %52 = arith.truncf %51 : vector<8x200xf32> to vector<8x200xbf16>
    %c0_29 = arith.constant 0 : index
    %c0_30 = arith.constant 0 : index
    %53 = vector.load %arg9[%c0_29, %c0_30] : memref<200x256xbf16, #tpu.memory_space<vmem>>, vector<200x256xbf16>
    %cst_31 = arith.constant dense<0.000000e+00> : vector<8x256xf32>
    %54 = tpu.matmul %52, %53, %cst_31 {dimension_numbers = #tpu.dot_dimension_numbers<[1], [0], [0], [1], [0, 0, 1, 1], [], []>} : vector<8x200xbf16>, vector<200x256xbf16>, vector<8x256xf32> -> vector<8x256xf32>
    %c7 = arith.constant 7 : index
    %c0_32 = arith.constant 0 : index
    %55 = vector.load %arg11[%c7, %c0_32] : memref<9x256xf32, #tpu.memory_space<vmem>>, vector<1x256xf32>
    %56 = vector.broadcast %55 : vector<1x256xf32> to vector<8x256xf32>
    %57 = arith.addf %54, %56 : vector<8x256xf32>
    %58 = math.tanh %57 : vector<8x256xf32>
    %c0_33 = arith.constant 0 : index
    %c0_34 = arith.constant 0 : index
    %59 = vector.load %arg12[%c0_33, %c0_34] : memref<8x256xf32, #tpu.memory_space<vmem>>, vector<8x256xf32>
    tpu.vector_store %arg12[%c0_33, %c0_34], %58 {strides = array<i32>} : memref<8x256xf32, #tpu.memory_space<vmem>>, vector<8x256xf32>,
    %60 = arith.truncf %37 : vector<8x16xf32> to vector<8x16xbf16>
    %c0_35 = arith.constant 0 : index
    %c0_36 = arith.constant 0 : index
    %61 = vector.load %arg10[%c0_35, %c0_36] : memref<16x4xbf16, #tpu.memory_space<vmem>>, vector<16x4xbf16>
    %cst_37 = arith.constant dense<0.000000e+00> : vector<8x4xf32>
    %62 = tpu.matmul %60, %61, %cst_37 {dimension_numbers = #tpu.dot_dimension_numbers<[1], [0], [0], [1], [0, 0, 1, 1], [], []>} : vector<8x16xbf16>, vector<16x4xbf16>, vector<8x4xf32> -> vector<8x4xf32>
    %c8 = arith.constant 8 : index
    %c0_38 = arith.constant 0 : index
    %63 = vector.load %arg11[%c8, %c0_38] : memref<9x256xf32, #tpu.memory_space<vmem>>, vector<1x4xf32>
    %64 = vector.broadcast %63 : vector<1x4xf32> to vector<8x4xf32>
    %65 = arith.addf %62, %64 : vector<8x4xf32>
    %66 = tpu.concatenate %65, %28 in 1 : vector<8x4xf32>, vector<8x2xf32> -> vector<8x6xf32>
    %c0_39 = arith.constant 0 : index
    %c0_40 = arith.constant 0 : index
    %67 = vector.load %arg13[%c0_39, %c0_40] : memref<8x6xf32, #tpu.memory_space<vmem>>, vector<8x6xf32>
    tpu.vector_store %arg13[%c0_39, %c0_40], %66 {strides = array<i32>} : memref<8x6xf32, #tpu.memory_space<vmem>>, vector<8x6xf32>,
    return
  }
  func.func @transform_0(%arg0: i32) -> (i32, i32) {
    %c0_i32 = arith.constant 0 : i32
    %c0_i32_0 = arith.constant 0 : i32
    return %arg0, %c0_i32 : i32, i32
  }
  func.func @transform_1(%arg0: i32) -> (i32, i32) {
    %c0_i32 = arith.constant 0 : i32
    %c0_i32_0 = arith.constant 0 : i32
    %c0_i32_1 = arith.constant 0 : i32
    return %c0_i32, %c0_i32_0 : i32, i32
  }
  func.func @transform_2(%arg0: i32) -> (i32, i32) {
    %c0_i32 = arith.constant 0 : i32
    %c0_i32_0 = arith.constant 0 : i32
    %c0_i32_1 = arith.constant 0 : i32
    return %c0_i32, %c0_i32_0 : i32, i32
  }
  func.func @transform_3(%arg0: i32) -> (i32, i32) {
    %c0_i32 = arith.constant 0 : i32
    %c0_i32_0 = arith.constant 0 : i32
    %c0_i32_1 = arith.constant 0 : i32
    return %c0_i32, %c0_i32_0 : i32, i32
  }
  func.func @transform_4(%arg0: i32) -> (i32, i32) {
    %c0_i32 = arith.constant 0 : i32
    %c0_i32_0 = arith.constant 0 : i32
    %c0_i32_1 = arith.constant 0 : i32
    return %c0_i32, %c0_i32_0 : i32, i32
  }
  func.func @transform_5(%arg0: i32) -> (i32, i32) {
    %c0_i32 = arith.constant 0 : i32
    %c0_i32_0 = arith.constant 0 : i32
    %c0_i32_1 = arith.constant 0 : i32
    return %c0_i32, %c0_i32_0 : i32, i32
  }
  func.func @transform_6(%arg0: i32) -> (i32, i32) {
    %c0_i32 = arith.constant 0 : i32
    %c0_i32_0 = arith.constant 0 : i32
    %c0_i32_1 = arith.constant 0 : i32
    return %c0_i32, %c0_i32_0 : i32, i32
  }
  func.func @transform_7(%arg0: i32) -> (i32, i32) {
    %c0_i32 = arith.constant 0 : i32
    %c0_i32_0 = arith.constant 0 : i32
    %c0_i32_1 = arith.constant 0 : i32
    return %c0_i32, %c0_i32_0 : i32, i32
  }
  func.func @transform_8(%arg0: i32) -> (i32, i32) {
    %c0_i32 = arith.constant 0 : i32
    %c0_i32_0 = arith.constant 0 : i32
    %c0_i32_1 = arith.constant 0 : i32
    return %c0_i32, %c0_i32_0 : i32, i32
  }
  func.func @transform_9(%arg0: i32) -> (i32, i32) {
    %c0_i32 = arith.constant 0 : i32
    %c0_i32_0 = arith.constant 0 : i32
    %c0_i32_1 = arith.constant 0 : i32
    return %c0_i32, %c0_i32_0 : i32, i32
  }
  func.func @transform_10(%arg0: i32) -> (i32, i32) {
    %c0_i32 = arith.constant 0 : i32
    %c0_i32_0 = arith.constant 0 : i32
    %c0_i32_1 = arith.constant 0 : i32
    return %c0_i32, %c0_i32_0 : i32, i32
  }
  func.func @transform_11(%arg0: i32) -> (i32, i32) {
    %c0_i32 = arith.constant 0 : i32
    %c0_i32_0 = arith.constant 0 : i32
    return %arg0, %c0_i32 : i32, i32
  }
  func.func @transform_12(%arg0: i32) -> (i32, i32) {
    %c0_i32 = arith.constant 0 : i32
    %c0_i32_0 = arith.constant 0 : i32
    return %arg0, %c0_i32 : i32, i32
  }
}

</mosaic_0001>

<bundles_post_ra>
// kernel: tpu_custom_call.1
= control target key start
LH: loop header
LB: loop body
LE: loop exit
PB: predicated region body
PF: predicated region fallthrough
CT: control target
= control target key end

     0   :  { %18 = vsyncpa [#allocation3], 0  ;;  %v1560_v2 = vmov 0   ;;  %s2038_s0 = inlined_call_operand.vmem [shape: f32[8,256], index: 0, kind: input, shape index: {}]   ;;  %s2039_s1 = inlined_call_operand.vmem [shape: bf16[256,200], index: 1, kind: input, shape index: {}]   ;;  %s2040_s2 = inlined_call_operand.vmem [shape: bf16[200,100], index: 2, kind: input, shape index: {}]   ;;  %s2041_s3 = inlined_call_operand.vmem [shape: bf16[100,20], index: 3, kind: input, shape index: {}]   ;;  %s2042_s4 = inlined_call_operand.vmem [shape: bf16[20,2], index: 4, kind: input, shape index: {}]   ;;  %s2043_s5 = inlined_call_operand.vmem [shape: bf16[2,36], index: 5, kind: input, shape index: {}]   ;;  %s2044_s6 = inlined_call_operand.vmem [shape: bf16[20,100], index: 6, kind: input, shape index: {}]   ;;  %s2045_s7 = inlined_call_operand.vmem [shape: bf16[100,200], index: 7, kind: input, shape index: {}]   ;;  %s2046_s8 = inlined_call_operand.vmem [shape: bf16[200,256], index: 8, kind: input, shape index: {}]   ;;  %s2047_s9 = inlined_call_operand.vmem [shape: bf16[16,4], index: 9, kind: input, shape index: {}]   ;;  %s2048_s10 = inlined_call_operand.vmem [shape: f32[9,256], index: 10, kind: input, shape index: {}]   ;;  %s2049_s11 = inlined_call_operand.hbm [shape: f32[8,256], index: 11, kind: output, shape index: {0}]   ;;  %s2050_s12 = inlined_call_operand.hbm [shape: f32[8,6], index: 12, kind: output, shape index: {1}]  }
   0x1   :  { %v1359_v0 = vld [vmem:[%s2039_s1 + $0x4] ss:$8 sps:$4 sm:$0xff]   ;;  %v1361_v1 = vld [vmem:[%s2039_s1] ss:$8 sps:$4 sm:$0xff]   ;;  %405 = vmatprep.subr.bf16.mxu1 %v1560_v2  ;;  %v1362_v3 = vld [vmem:[%s2039_s1 + $0x14] ss:$8 sps:$4 sm:$0xff]  }
   0x2   :  { %251 = vmatprep.subr.bf16.mxu0 %v1359_v0  ;;  %v1364_v4 = vld [vmem:[%s2039_s1 + $0x10] ss:$8 sps:$4 sm:$0xff]   ;;  %v1365_v5 = vld [vmem:[%s2039_s1 + $0x24] ss:$8 sps:$4 sm:$0xff]   ;;  %v1367_v6 = vld [vmem:[%s2039_s1 + $0x20] ss:$8 sps:$4 sm:$0xff]  }
   0x3   :  { %252 = vmatpush1.bf16.msra.mxu0 %v1361_v1  ;;  %v1368_v7 = vld [vmem:[%s2039_s1 + $0x34] ss:$8 sps:$4 sm:$0xff]   ;;  %v1370_v8 = vld [vmem:[%s2039_s1 + $0x30] ss:$8 sps:$4 sm:$0xff]   ;;  %v1371_v9 = vld [vmem:[%s2039_s1 + $0x44] ss:$8 sps:$4 sm:$0xff]  }
   0x4   :  { %253 = vmatprep.subr.bf16.mxu0 %v1362_v3  ;;  %v1373_v10 = vld [vmem:[%s2039_s1 + $0x40] ss:$8 sps:$4 sm:$0xff]   ;;  %v1374_v11 = vld [vmem:[%s2039_s1 + $0x54] ss:$8 sps:$4 sm:$0xff]   ;;  %v1376_v12 = vld [vmem:[%s2039_s1 + $0x50] ss:$8 sps:$4 sm:$0xff]  }
   0x5   :  { %v1377_v13 = vld [vmem:[%s2039_s1 + $0x64] ss:$8 sps:$4 sm:$0xff]   ;;  %v1379_v17 = vld [vmem:[%s2039_s1 + $0x60] ss:$8 sps:$4 sm:$0xff]   ;;  %v1380_v18 = vld [vmem:[%s2039_s1 + $0x74] ss:$8 sps:$4 sm:$0xff]  }
   0x6   :  { %v44_v14 = vld [vmem:[%s2038_s0 + $0x8] sm:$0xff]  ;;  %v1407_v16 = vld [vmem:[%s2040_s2] sm:$0xff]   ;;  %v1382_v20 = vld [vmem:[%s2039_s1 + $0x70] ss:$8 sps:$4 sm:$0xff]  }
   0x7   :  { %254 = vmatpush1.bf16.msra.mxu0 %v1364_v4  ;;  %v46_v15 = vpack.c.bf16 %v44_v14, %v44_v14  ;;  %406 = vmatpush1.bf16.msra.mxu1 %v1407_v16  ;;  %v1408_v19 = vld [vmem:[%s2040_s2 + $0x8] sm:$0xff]   ;;  %v1409_v23 = vld [vmem:[%s2040_s2 + $0x10] sm:$0xff]   ;;  %v1410_v25 = vld [vmem:[%s2040_s2 + $0x18] sm:$0xff]  }
   0x8   :  { %255 = vmatprep.subr.bf16.mxu0 %v1365_v5  ;;  %407 = vmatprep.subr.bf16.mxu1 %v1560_v2  ;;  %v1383_v21 = vld [vmem:[%s2039_s1 + $0x84] ss:$8 sps:$4 sm:$0xff]   ;;  %v1385_v22 = vld [vmem:[%s2039_s1 + $0x80] ss:$8 sps:$4 sm:$0xff]   ;;  %v1386_v24 = vld [vmem:[%s2039_s1 + $0x94] ss:$8 sps:$4 sm:$0xff]  }
   0x9   :  { %283 = vmatprep.mubr.bf16.mxu0 %v46_v15  ;;  %v1388_v26 = vld [vmem:[%s2039_s1 + $0x90] ss:$8 sps:$4 sm:$0xff]   ;;  %v1389_v27 = vld [vmem:[%s2039_s1 + $0xa4] ss:$8 sps:$4 sm:$0xff]   ;;  %v1391_v29 = vld [vmem:[%s2039_s1 + $0xa0] ss:$8 sps:$4 sm:$0xff]  }
   0xa   :  { %v1411_v28 = vld [vmem:[%s2040_s2 + $0x20] sm:$0xff]   ;;  %v1392_v30 = vld [vmem:[%s2039_s1 + $0xb4] ss:$8 sps:$4 sm:$0xff]   ;;  %v1412_v31 = vld [vmem:[%s2040_s2 + $0x28] sm:$0xff]  }
   0xb   :  { %256 = vmatpush1.bf16.msra.mxu0 %v1367_v6  ;;  %408 = vmatpush1.bf16.msra.mxu1 %v1408_v19  ;;  %v1394_v32 = vld [vmem:[%s2039_s1 + $0xb0] ss:$8 sps:$4 sm:$0xff]   ;;  %v1395_v33 = vld [vmem:[%s2039_s1 + $0xc4] ss:$8 sps:$4 sm:$0xff]   ;;  %v1397_v35 = vld [vmem:[%s2039_s1 + $0xc0] ss:$8 sps:$4 sm:$0xff]  }
   0xc   :  { %257 = vmatprep.subr.bf16.mxu0 %v1368_v7  ;;  %409 = vmatprep.subr.bf16.mxu1 %v1560_v2  ;;  %v1413_v34 = vld [vmem:[%s2040_s2 + $0x30] sm:$0xff]   ;;  %v1414_v37 = vld [vmem:[%s2040_s2 + $0x38] sm:$0xff]   ;;  %v1401_v39 = vld [vmem:[%s2039_s1 + $0xe4] ss:$8 sps:$4 sm:$0xff]  }
   0xd   :  { %v1398_v36 = vld [vmem:[%s2039_s1 + $0xd4] ss:$8 sps:$4 sm:$0xff]   ;;  %v1400_v38 = vld [vmem:[%s2039_s1 + $0xd0] ss:$8 sps:$4 sm:$0xff]  }
   0xf   :  { %258 = vmatpush1.bf16.msra.mxu0 %v1370_v8  ;;  %410 = vmatpush1.bf16.msra.mxu1 %v1409_v23 }
  0x10   :  { %259 = vmatprep.subr.bf16.mxu0 %v1371_v9  ;;  %411 = vmatprep.subr.bf16.mxu1 %v1560_v2 }
  0x13   :  { %260 = vmatpush1.bf16.msra.mxu0 %v1373_v10  ;;  %412 = vmatpush1.bf16.msra.mxu1 %v1410_v25 }
  0x14   :  { %261 = vmatprep.subr.bf16.mxu0 %v1374_v11  ;;  %413 = vmatprep.subr.bf16.mxu1 %v1560_v2 }
  0x17   :  { %262 = vmatpush1.bf16.msra.mxu0 %v1376_v12  ;;  %414 = vmatpush1.bf16.msra.mxu1 %v1411_v28 }
  0x18   :  { %263 = vmatprep.subr.bf16.mxu0 %v1377_v13  ;;  %415 = vmatprep.subr.bf16.mxu1 %v1560_v2 }
  0x1b   :  { %264 = vmatpush1.bf16.msra.mxu0 %v1379_v17  ;;  %416 = vmatpush1.bf16.msra.mxu1 %v1412_v31 }
  0x1c   :  { %265 = vmatprep.subr.bf16.mxu0 %v1380_v18  ;;  %417 = vmatprep.subr.bf16.mxu1 %v1560_v2 }
  0x1f   :  { %266 = vmatpush1.bf16.msra.mxu0 %v1382_v20  ;;  %418 = vmatpush1.bf16.msra.mxu1 %v1413_v34 }
  0x20   :  { %267 = vmatprep.subr.bf16.mxu0 %v1383_v21  ;;  %419 = vmatprep.subr.bf16.mxu1 %v1560_v2 }
  0x23   :  { %268 = vmatpush1.bf16.msra.mxu0 %v1385_v22 }
  0x24   :  { %269 = vmatprep.subr.bf16.mxu0 %v1386_v24 }
  0x27   :  { %270 = vmatpush1.bf16.msra.mxu0 %v1388_v26 }
  0x28   :  { %271 = vmatprep.subr.bf16.mxu0 %v1389_v27 }
  0x2b   :  { %272 = vmatpush1.bf16.msra.mxu0 %v1391_v29 }
  0x2c   :  { %273 = vmatprep.subr.bf16.mxu0 %v1392_v30 }
  0x2f   :  { %274 = vmatpush1.bf16.msra.mxu0 %v1394_v32 }
  0x30   :  { %275 = vmatprep.subr.bf16.mxu0 %v1395_v33 }
  0x33   :  { %276 = vmatpush1.bf16.msra.mxu0 %v1397_v35 }
  0x34   :  { %277 = vmatprep.subr.bf16.mxu0 %v1398_v36 }
  0x35   :  { %19 = vsyncpa [#allocation5], 0  ;;  %420 = vmatpush1.bf16.msra.mxu1 %v1414_v37  ;;  %v1415_v40 = vld [vmem:[%s2040_s2 + $0x40] sm:$0xff]   ;;  %v1404_v42 = vld [vmem:[%s2039_s1 + $0xf4] ss:$8 sps:$4 sm:$0xff]   ;;  %vm401_vm0 = vcmask 1043456   ;;  %v81_v52 = vlaneseq }
  0x36   :  { %421 = vmatprep.subr.bf16.mxu1 %v1560_v2  ;;  %v1403_v41 = vld [vmem:[%s2039_s1 + $0xe0] ss:$8 sps:$4 sm:$0xff]   ;;  %v1406_v43 = vld [vmem:[%s2039_s1 + $0xf0] ss:$8 sps:$4 sm:$0xff]   ;;  %v1561_v51 = vmov 0.0   ;;  %vm397_vm1 = vcmask 588800  }
  0x37   :  { %278 = vmatpush1.bf16.msra.mxu0 %v1400_v38  ;;  %v43_v44 = vld [vmem:[%s2038_s0] sm:$0xff]  ;;  %v1416_v46 = vld [vmem:[%s2040_s2 + $0x48] sm:$0xff]   ;;  %v1417_v47 = vld [vmem:[%s2040_s2 + $0x50] sm:$0xff]   ;;  %v82_v53 = vshrl.u32 %v81_v52, 7  ;;  %vm504_vm2 = vcmask 1041408   ;;  %vm1562_vm3 = vmmov 0  }
  0x38   :  { %279 = vmatprep.subr.bf16.mxu0 %v1401_v39  ;;  %v45_v45 = vpack.c.bf16 %v43_v44, %v43_v44  ;;  %v1418_v48 = vld [vmem:[%s2040_s2 + $0x58] sm:$0xff]   ;;  %v1419_v49 = vld [vmem:[%s2040_s2 + $0x60] ss:$0 sps:$4 sm:$0xff]   ;;  %v1421_v7 = vld [vmem:[%s2041_s3 + $0x8] sm:$0xff]   ;;  %vm500_vm4 = vcmask 818176   ;;  %vm563_vm5 = vcmask 162816  }
  0x39   :  { %422 = vmatpush1.bf16.msra.mxu1 %v1415_v40  ;;  %v403_v50 = vsel %vm401_vm0, %v1419_v49, 0  ;;  %v1789_v54 = vsub.s32 0, %v82_v53  ;;  %v79_v55 = vld [vmem:[%s2048_s10] ss:$8 sm:$0x3]  ;;  %v1794_v56 = vsub.s32 1, %v82_v53 }
  0x3a   :  { %423 = vmatprep.subr.bf16.mxu1 %v1560_v2  ;;  %v1420_v5 = vld [vmem:[%s2041_s3] sm:$0xff]   ;;  %v1422_v8 = vld [vmem:[%s2041_s3 + $0x10] sm:$0xff]   ;;  %v1423_v9 = vld [vmem:[%s2041_s3 + $0x18] sm:$0xff]   ;;  %vm618_vm6 = vcmask 1040384   ;;  %vm614_vm7 = vcmask 15360   ;;  %s1563_s22 = smov 108  }
  0x3b   :  { %280 = vmatpush1.bf16.msra.mxu0 %v1403_v41  ;;  %v84_v57 = vrot.slane %v79_v55, %v1789_v54  ;;  %v88_v58 = vrot.slane %v79_v55, %v1794_v56  ;;  %v1424_v10 = vld [vmem:[%s2041_s3 + $0x20] sm:$0xff]   ;;  %v1425_v11 = vld [vmem:[%s2041_s3 + $0x28] sm:$0xff]   ;;  %v1426_v12 = vld [vmem:[%s2041_s3 + $0x30] ss:$0 sps:$4 sm:$0x33]   ;;  %s1564_s23 = smov 4  }
  0x3c   :  { %281 = vmatprep.subr.bf16.mxu0 %v1404_v42  ;;  %v506_v13 = vsel %vm504_vm2, %v1426_v12, 0  ;;  %v321_v14 = vld [vmem:[%s2048_s10 + $0x1] ss:$0 sm:$0xff]  ;;  %v1428_v23 = vld [vmem:[%s2042_s4 + $0x8] ss:$0 sps:$4 sm:$0x33]  }
  0x3d   :  { %424 = vmatpush1.bf16.msra.mxu1 %v1416_v46  ;;  %v1427_v22 = vld [vmem:[%s2042_s4] sm:$0xff]   ;;  %v568_v24 = vsel %vm504_vm2, %v1428_v23, 0  ;;  %v1436_v55 = vld [vmem:[%s2045_s7 + $0x14] ss:$8 sps:$4 sm:$0xff]   ;;  %v1455_v12 = vld [vmem:[%s2046_s8 + $0x10] ss:$8 sps:$4 sm:$0xff]  }
  0x3e   :  { %425 = vmatprep.subr.bf16.mxu1 %v1560_v2  ;;  %v460_v25 = vld [vmem:[%s2048_s10 + $0x2] ss:$0 sm:$0xff]  ;;  %v612_v33 = vld [vmem:[%s2043_s5] sm:$0x1]  ;;  %v553_v35 = vld [vmem:[%s2048_s10 + $0x3] ss:$0 sm:$0xff] }
  0x3f   :  { %282 = vmatpush1.bf16.msra.mxu0 %v1406_v43  ;;  %v620_v34 = vsel %vm618_vm6, %v612_v33, 0  ;;  %v1429_v42 = vld [vmem:[%s2044_s6] sm:$0xff]   ;;  %v1430_v43 = vld [vmem:[%s2044_s6 + $0x8] ss:$0 sps:$4 sm:$0x33]   ;;  %vm1099_vm8 = vcmask 130048  }
  0x40   :  { %1332 = vmatprep.subr.bf16.mxu0 %v1561_v51  ;;  %v681_v44 = vsel %vm504_vm2, %v1430_v43, 0  ;;  %v1431_v52 = vld [vmem:[%s2045_s7] ss:$8 sps:$4 sm:$0xff]   ;;  %v1433_v53 = vld [vmem:[%s2045_s7 + $0x4] ss:$8 sps:$4 sm:$0xff]   ;;  %vm1147_vm9 = vcmask 31744  }
  0x41   :  { %426 = vmatpush1.bf16.msra.mxu1 %v1417_v47  ;;  %v1475_v23 = vld [vmem:[%s2046_s8 + $0x74] ss:$8 sps:$4 sm:$0xff]   ;;  %vm1149_vm10 = vcmask 48128   ;;  %s1565_s20 = smov [#allocation4]  }
  0x42   :  { %284 = vmatmul.mubr.bf16.vlgmr.msra.gmra.mrb[0].mxu0 %v45_v45  ;;  %427 = vmatprep.subr.bf16.mxu1 %v1560_v2  ;;  %v613_v45 = vld [vmem:[%s2048_s10 + $0x4] ss:$0 sm:$0xff]  ;;  %s1167_s1 = sshll.u32 %s1565_s20, 4  ;;  %s1168_s1 = int_to_ptr.vmem [resolvable:$true] %s1167_s1 }
  0x43   :  { %1334 = vmatprep.mubr.msk.bf16.mxu0 %vm1562_vm3, %v1561_v51  ;;  %1333 = vmatpush3.bf16.msra.mxu0 %v620_v34  ;;  %v1451_v34 = vld [vmem:[%s2047_s9] sm:$0xff]   ;;  %p1517_p1 = scmp.lt.s32.totalorder %s1168_s1, %s1168_s1 }
  0x44   :  { %1338 = vmatprep.subr.bf16.mxu0 %v1561_v51 }
  0x45   :  { %428 = vmatpush1.bf16.msra.mxu1 %v1418_v48 }
  0x46   :  { %429 = vmatprep.subr.bf16.mxu1 %v1560_v2 }
  0x49   :  { %430 = vmatpush1.bf16.msra.mxu1 %v403_v50 }
  0x4a   :  { %1306 = vmatprep.subr.bf16.mxu1 %v1561_v51 }
 0x115   :  { %v285_v59 = vpop.f32.mrb[0].mxu0 }
 0x116   :  { %v286_v60 = vadd.f32 %v285_v59, %v84_v57  ;;  %v287_v61 = vpop.f32.mrb[1].mxu0  ;;  %v1434_v57 = vld [vmem:[%s2045_s7 + $0x10] ss:$8 sps:$4 sm:$0xff]  }
 0x117   :  { %v288_v62 = vadd.f32 %v287_v61, %v88_v58  ;;  %v289_v63 = vpop.f32.mrb[2].mxu0  ;;  %v1439_v58 = vld [vmem:[%s2045_s7 + $0x24] ss:$8 sps:$4 sm:$0xff]  }
 0x118   :  { %1490 = vtanh.f32 %v286_v60  ;;  %v290_v0 = vpop.f32.mrb[3].mxu0  ;;  %v1437_v60 = vld [vmem:[%s2045_s7 + $0x20] ss:$8 sps:$4 sm:$0xff]   ;;  %v1440_v63 = vld [vmem:[%s2045_s7 + $0x30] ss:$8 sps:$4 sm:$0xff]  }
 0x119   :  { %1492 = vtanh.f32 %v288_v62  ;;  %v1442_v62 = vld [vmem:[%s2045_s7 + $0x34] ss:$8 sps:$4 sm:$0xff]   ;;  %v1445_v0 = vld [vmem:[%s2045_s7 + $0x44] ss:$8 sps:$4 sm:$0xff]  }
 0x122   :  { %v1491_v1 = vpop.eup %1490 }
 0x123   :  { %v1493_v3 = vpop.eup %1492  ;;  %v294_v6 = vpack.c.bf16 %v1491_v1, %v1491_v1  ;;  %v1443_v1 = vld [vmem:[%s2045_s7 + $0x40] ss:$8 sps:$4 sm:$0xff]  }
 0x124   :  { %v295_v4 = vpack.c.bf16 %v1493_v3, %v1493_v3  ;;  %v1448_v3 = vld [vmem:[%s2045_s7 + $0x54] ss:$8 sps:$4 sm:$0xff]  }
 0x126   :  { %1224 = vmatprep.mubr.msk.bf16.mxu1 %vm397_vm1, %v295_v4  ;;  %v1446_v4 = vld [vmem:[%s2045_s7 + $0x50] ss:$8 sps:$4 sm:$0xff]  }
 0x127   :  { %438 = vmatmul.mubr.bf16.vlgmr.msra.gmra.mrb[0].mxu1 %v294_v6 }
 0x128   :  { %1307 = vmatpush3.bf16.msra.mxu1 %v1420_v5  ;;  %1320 = vmatprep.mubr.msk.bf16.mxu1 %vm1562_vm3, %v1561_v51  ;;  %v737_v5 = vld [vmem:[%s2045_s7 + $0x60] sm:$0x33]  ;;  %s1512_s7 = scalar_lea.vmem %s1168_s1, 128 }
 0x129   :  { %1308 = vmatprep.subr.bf16.mxu1 %v1561_v51  ;;  %v1254_v6 = vcombine.high %v737_v5, %v737_v5  ;;  %p1513_p0 = scmp.ne.s32.totalorder %s1168_s1, %s1512_s7  ;;  %p1518_p2 = scmp.lt.s32.totalorder %s1512_s7, %s1512_s7 }
 0x12b   :  { %p1519_p3 = por %p1518_p2, %p1517_p1 }
 0x12c   :  { %1309 = vmatpush3.bf16.msra.mxu1 %v1421_v7  ;;  %v1253_v7 = vcombine.low %v737_v5, %v737_v5 }
 0x12d   :  { %1310 = vmatprep.subr.bf16.mxu1 %v1561_v51  ;;  %p1520_p4 = pnand %p1519_p3, %p1513_p0 }
 0x130   :  { %1311 = vmatpush3.bf16.msra.mxu1 %v1422_v8  ;;  %v820_v8 = vsel %vm504_vm2, %v1253_v7, 0 }
 0x131   :  { %1312 = vmatprep.subr.bf16.mxu1 %v1561_v51 }
 0x134   :  { %1313 = vmatpush3.bf16.msra.mxu1 %v1423_v9  ;;  %v1452_v9 = vld [vmem:[%s2046_s8] ss:$8 sps:$4 sm:$0xff]  }
 0x135   :  { %1314 = vmatprep.subr.bf16.mxu1 %v1561_v51 }
 0x138   :  { %1315 = vmatpush3.bf16.msra.mxu1 %v1424_v10  ;;  %v1454_v10 = vld [vmem:[%s2046_s8 + $0x4] ss:$8 sps:$4 sm:$0xff]  }
 0x139   :  { %1316 = vmatprep.subr.bf16.mxu1 %v1561_v51 }
 0x13c   :  { %1317 = vmatpush3.bf16.msra.mxu1 %v1425_v11  ;;  %v1457_v11 = vld [vmem:[%s2046_s8 + $0x14] ss:$8 sps:$4 sm:$0xff]  }
 0x13d   :  { %1318 = vmatprep.subr.bf16.mxu1 %v1561_v51 }
 0x140   :  { %1319 = vmatpush3.bf16.msra.mxu1 %v506_v13  ;;  %v1460_v13 = vld [vmem:[%s2046_s8 + $0x24] ss:$8 sps:$4 sm:$0xff]  }
 0x141   :  { %1324 = vmatprep.subr.bf16.mxu1 %v1561_v51 }
 0x1fa   :  { %v439_v15 = vpop.f32.mrb[0].mxu1 }
 0x1fb   :  { %v440_v16 = vadd.f32 %v439_v15, %v321_v14  ;;  %v441_v17 = vpop.f32.mrb[1].mxu1  ;;  %v1458_v14 = vld [vmem:[%s2046_s8 + $0x20] ss:$8 sps:$4 sm:$0xff]   ;;  %v1463_v15 = vld [vmem:[%s2046_s8 + $0x34] ss:$8 sps:$4 sm:$0xff]  }
 0x1fc   :  { %v442_v18 = vpop.f32.mrb[2].mxu1  ;;  %v1466_v17 = vld [vmem:[%s2046_s8 + $0x44] ss:$8 sps:$4 sm:$0xff]  }
 0x1fd   :  { %1494 = vtanh.f32 %v440_v16  ;;  %v443_v19 = vpop.f32.mrb[3].mxu1  ;;  %v1461_v16 = vld [vmem:[%s2046_s8 + $0x30] ss:$8 sps:$4 sm:$0xff]   ;;  %v1464_v18 = vld [vmem:[%s2046_s8 + $0x40] ss:$8 sps:$4 sm:$0xff]  }
 0x1fe   :  { %v1469_v19 = vld [vmem:[%s2046_s8 + $0x54] ss:$8 sps:$4 sm:$0xff]  }
 0x207   :  { %v1495_v20 = vpop.eup %1494 }
 0x208   :  { %v446_v21 = vpack.c.bf16 %v1495_v20, %v1495_v20  ;;  %v1467_v20 = vld [vmem:[%s2046_s8 + $0x50] ss:$8 sps:$4 sm:$0xff]  }
 0x20a   :  { %1321 = vmatmul.mubr.msk.bf16.vlgmr.msra.gmra.mrb[4].mxu1 %vm500_vm4, %v446_v21  ;;  %v1472_v21 = vld [vmem:[%s2046_s8 + $0x64] ss:$8 sps:$4 sm:$0xff]  }
 0x20b   :  { %1328 = vmatprep.mubr.msk.bf16.mxu1 %vm1562_vm3, %v1561_v51  ;;  %1325 = vmatpush3.bf16.msra.mxu1 %v1427_v22  ;;  %v1470_v22 = vld [vmem:[%s2046_s8 + $0x60] ss:$8 sps:$4 sm:$0xff]  }
 0x20c   :  { %1326 = vmatprep.subr.bf16.mxu1 %v1561_v51 }
 0x20f   :  { %1327 = vmatpush3.bf16.msra.mxu1 %v568_v24  ;;  %v1473_v24 = vld [vmem:[%s2046_s8 + $0x70] ss:$8 sps:$4 sm:$0xff]  }
 0x210   :  { %825 = vmatprep.subr.bf16.mxu1 %v1433_v53 }
 0x2dd   :  { %v542_v26 = vpop.f32.mrb[4].mxu1 }
 0x2de   :  { %v543_v27 = vadd.f32 %v542_v26, %v460_v25  ;;  %v1322_v28 = vpop.f32.mrb[5].mxu1  ;;  %v1478_v25 = vld [vmem:[%s2046_s8 + $0x84] ss:$8 sps:$4 sm:$0xff]   ;;  %v1476_v26 = vld [vmem:[%s2046_s8 + $0x80] ss:$8 sps:$4 sm:$0xff]  }
 0x2df   :  { %v545_v29 = vpop.f32.mrb[6].mxu1 }
 0x2e0   :  { %1496 = vtanh.f32 %v543_v27  ;;  %v1323_v30 = vpop.f32.mrb[7].mxu1  ;;  %v667_v27 = vld [vmem:[%s2048_s10 + $0x5] ss:$0 sm:$0xff] }
 0x2ea   :  { %v1497_v31 = vpop.eup %1496 }
 0x2eb   :  { %v549_v32 = vpack.c.bf16 %v1497_v31, %v1497_v31 }
 0x2ed   :  { %1329 = vmatmul.mubr.msk.bf16.vlgmr.msra.gmra.mrb[8].mxu1 %vm563_vm5, %v549_v32 }
 0x2ee   :  { %857 = vmatprep.mubr.bf16.mxu1 %v1560_v2  ;;  %826 = vmatpush1.bf16.msra.mxu1 %v1431_v52 }
 0x2ef   :  { %827 = vmatprep.subr.bf16.mxu1 %v1436_v55 }
 0x2f2   :  { %828 = vmatpush1.bf16.msra.mxu1 %v1434_v57  ;;  %v1089_v57 = vld [vmem:[%s2048_s10 + $0x10] ss:$0 sm:$0xff] }
 0x2f3   :  { %829 = vmatprep.subr.bf16.mxu1 %v1439_v58 }
 0x2f6   :  { %830 = vmatpush1.bf16.msra.mxu1 %v1437_v60 }
 0x2f7   :  { %831 = vmatprep.subr.bf16.mxu1 %v1442_v62 }
 0x2fa   :  { %832 = vmatpush1.bf16.msra.mxu1 %v1440_v63 }
 0x2fb   :  { %833 = vmatprep.subr.bf16.mxu1 %v1445_v0 }
 0x2fe   :  { %834 = vmatpush1.bf16.msra.mxu1 %v1443_v1 }
 0x2ff   :  { %835 = vmatprep.subr.bf16.mxu1 %v1448_v3 }
 0x302   :  { %836 = vmatpush1.bf16.msra.mxu1 %v1446_v4 }
 0x303   :  { %1255 = vmatprep.subr.msk.bf16.mxu1 %vm504_vm2, %v1254_v6 }
 0x306   :  { %838 = vmatpush1.bf16.msra.mxu1 %v820_v8 }
 0x307   :  { %1346 = vmatprep.subr.bf16.mxu1 %v1561_v51 }
 0x3c0   :  { %v604_v36 = vpop.f32.mrb[8].mxu1 }
 0x3c1   :  { %v605_v37 = vadd.f32 %v604_v36, %v553_v35  ;;  %v1330_v38 = vpop.f32.mrb[9].mxu1 }
 0x3c2   :  { %v607_v39 = vpop.f32.mrb[10].mxu1  ;;  %v1479_v38 = vld [vmem:[%s2046_s8 + $0x90] ss:$8 sps:$4 sm:$0xff]  }
 0x3c3   :  { %1498 = vtanh.f32 %v605_v37  ;;  %v1331_v40 = vpop.f32.mrb[11].mxu1  ;;  %v1481_v37 = vld [vmem:[%s2046_s8 + $0x94] ss:$8 sps:$4 sm:$0xff]   ;;  %v1484_v39 = vld [vmem:[%s2046_s8 + $0xa4] ss:$8 sps:$4 sm:$0xff]  }
 0x3c4   :  { %v1487_v40 = vld [vmem:[%s2046_s8 + $0xb4] ss:$8 sps:$4 sm:$0xff]  }
 0x3cd   :  { %v1499_v2 = vpop.eup %1498 }
 0x3ce   :  { %v611_v41 = vpack.c.bf16 %v1499_v2, %v1499_v2 }
 0x3d0   :  { %1335 = vmatmul.mubr.msk.bf16.vlgmr.msra.gmra.mrb[4].mxu0 %vm614_vm7, %v611_v41  ;;  %v894_v41 = vld [vmem:[%s2046_s8 + $0xc0] sm:$0xff] }
 0x3d1   :  { %1342 = vmatprep.mubr.msk.bf16.mxu0 %vm1562_vm3, %v1561_v51  ;;  %1339 = vmatpush3.bf16.msra.mxu0 %v1429_v42  ;;  %v1283_v42 = vcombine.high %v894_v41, %v894_v41  ;;  %v1282_v43 = vcombine.low %v894_v41, %v894_v41 }
 0x3d2   :  { %1340 = vmatprep.subr.bf16.mxu0 %v1561_v51 }
 0x3d5   :  { %1341 = vmatpush3.bf16.msra.mxu0 %v681_v44  ;;  %v1037_v44 = vsel %vm401_vm0, %v1282_v43, 0 }
 0x3d6   :  { %1042 = vmatprep.subr.bf16.mxu0 %v1454_v10 }
 0x4a3   :  { %v656_v46 = vpop.f32.mrb[4].mxu0 }
 0x4a4   :  { %v657_v47 = vadd.f32 %v656_v46, %v613_v45  ;;  %v1336_v48 = vpop.f32.mrb[5].mxu0  ;;  %v1240_v45 = vld [vmem:[%s2048_s10 + $0x6] ss:$8 sm:$0x3] }
 0x4a5   :  { %v659_v49 = vpop.f32.mrb[6].mxu0  ;;  %v744_v46 = vrot.slane %v1240_v45, %v1789_v54 }
 0x4a6   :  { %1500 = vtanh.f32 %v657_v47  ;;  %v1337_v50 = vpop.f32.mrb[7].mxu0  ;;  %v748_v47 = vrot.slane %v1240_v45, %v1794_v56 }
 0x4b0   :  { %v1501_v59 = vpop.eup %1500 }
 0x4b1   :  { %v663_v61 = vpack.c.bf16 %v1501_v59, %v1501_v59 }
 0x4b3   :  { %1091 = vrot.lane.b32.xlu0 %v663_v61, %s1563_s22  ;;  %1343 = vmatmul.mubr.msk.bf16.vlgmr.msra.gmra.mrb[8].mxu0 %vm563_vm5, %v663_v61 }
 0x4b4   :  { %1043 = vmatpush1.bf16.msra.mxu0 %v1452_v9 }
 0x4b5   :  { %1044 = vmatprep.subr.bf16.mxu0 %v1457_v11 }
 0x4b7   :  { %1144 = vrot.lane.b32.xlu0 %v1499_v2, %s1564_s23  ;;  %v1485_v2 = vld [vmem:[%s2046_s8 + $0xb0] ss:$8 sps:$4 sm:$0xff]  }
 0x4b8   :  { %1045 = vmatpush1.bf16.msra.mxu0 %v1455_v12 }
 0x4b9   :  { %1046 = vmatprep.subr.bf16.mxu0 %v1460_v13 }
 0x4bc   :  { %1047 = vmatpush1.bf16.msra.mxu0 %v1458_v14 }
 0x4bd   :  { %1048 = vmatprep.subr.bf16.mxu0 %v1463_v15 }
 0x4c0   :  { %1049 = vmatpush1.bf16.msra.mxu0 %v1461_v16 }
 0x4c1   :  { %1050 = vmatprep.subr.bf16.mxu0 %v1466_v17 }
 0x4c4   :  { %1051 = vmatpush1.bf16.msra.mxu0 %v1464_v18 }
 0x4c5   :  { %1052 = vmatprep.subr.bf16.mxu0 %v1469_v19 }
 0x4c8   :  { %1053 = vmatpush1.bf16.msra.mxu0 %v1467_v20 }
 0x4c9   :  { %1054 = vmatprep.subr.bf16.mxu0 %v1472_v21 }
 0x4cc   :  { %1055 = vmatpush1.bf16.msra.mxu0 %v1470_v22 }
 0x4cd   :  { %1056 = vmatprep.subr.bf16.mxu0 %v1475_v23 }
 0x4d0   :  { %1057 = vmatpush1.bf16.msra.mxu0 %v1473_v24 }
 0x4d1   :  { %1058 = vmatprep.subr.bf16.mxu0 %v1478_v25 }
 0x4d4   :  { %1059 = vmatpush1.bf16.msra.mxu0 %v1476_v26 }
 0x4d5   :  { %1060 = vmatprep.subr.bf16.mxu0 %v1481_v37 }
 0x4d8   :  { %1061 = vmatpush1.bf16.msra.mxu0 %v1479_v38 }
 0x4d9   :  { %1062 = vmatprep.subr.bf16.mxu0 %v1484_v39 }
 0x525   :  { %v1092_v36 = vpop.permute.xlu0 %1091 }
 0x529   :  { %v1145_v61 = vpop.permute.xlu0 %1144 }
 0x586   :  { %v717_v28 = vpop.f32.mrb[8].mxu0 }
 0x587   :  { %v718_v29 = vadd.f32 %v717_v28, %v667_v27  ;;  %v1344_v30 = vpop.f32.mrb[9].mxu0 }
 0x588   :  { %v720_v31 = vpop.f32.mrb[10].mxu0 }
 0x589   :  { %1502 = vtanh.f32 %v718_v29  ;;  %v1345_v32 = vpop.f32.mrb[11].mxu0 }
 0x593   :  { %v1503_v33 = vpop.eup %1502 }
 0x594   :  { %v724_v35 = vpack.c.bf16 %v1503_v33, %v1503_v33 }
 0x596   :  { %1256 = vmatmul.mubr.msk.bf16.vlgmr.msra.gmra.mrb[12].mxu1 %vm500_vm4, %v724_v35 }
 0x597   :  { %1347 = vmatpush3.bf16.msra.mxu1 %v1451_v34  ;;  %1348 = vmatprep.mubr.msk.bf16.mxu1 %vm1562_vm3, %v1561_v51  ;;  %v1482_v51 = vld [vmem:[%s2046_s8 + $0xa0] ss:$8 sps:$4 sm:$0xff]  }
 0x598   :  { %1063 = vmatpush1.bf16.msra.mxu0 %v1482_v51 }
 0x599   :  { %1064 = vmatprep.subr.bf16.mxu0 %v1487_v40 }
 0x59c   :  { %1065 = vmatpush1.bf16.msra.mxu0 %v1485_v2 }
 0x59d   :  { %1284 = vmatprep.subr.msk.bf16.mxu0 %vm401_vm0, %v1283_v42 }
 0x59e   :  { %1349 = vmatmul.mubr.msk.bf16.vlgmr.msra.gmra.mrb[16].mxu1 %vm1099_vm8, %v1092_v36 }
 0x5a0   :  { %1067 = vmatpush1.bf16.msra.mxu0 %v1037_v44 }
 0x669   :  { %v859_v48 = vpop.f32.mrb[12].mxu1 }
 0x66a   :  { %v860_v49 = vadd.f32 %v859_v48, %v744_v46  ;;  %v861_v50 = vpop.f32.mrb[13].mxu1 }
 0x66b   :  { %v862_v52 = vadd.f32 %v861_v50, %v748_v47  ;;  %v863_v53 = vpop.f32.mrb[14].mxu1 }
 0x66c   :  { %1504 = vtanh.f32 %v860_v49  ;;  %v864_v55 = vpop.f32.mrb[15].mxu1 }
 0x66d   :  { %1506 = vtanh.f32 %v862_v52 }
 0x671   :  { %v1137_v58 = vpop.f32.mrb[16].mxu1 }
 0x672   :  { %v1138_v59 = vadd.f32 %v1137_v58, %v1089_v57  ;;  %v1350_v60 = vpop.f32.mrb[17].mxu1 }
 0x673   :  { %v1140_v62 = vpop.f32.mrb[18].mxu1 }
 0x674   :  { %v1351_v63 = vpop.f32.mrb[19].mxu1  ;;  %v1148_v0 = vsel %vm1147_vm9, %v1138_v59, %v1145_v61 }
 0x675   :  { %1150 = vst.msk [vmem:[#allocation4] sm:$0xff] %vm1149_vm10, %v1148_v0 }
 0x676   :  { %v1505_v1 = vpop.eup %1504 }
 0x677   :  { %v1507_v3 = vpop.eup %1506  ;;  %v868_v5 = vpack.c.bf16 %v1505_v1, %v1505_v1 }
 0x678   :  { %v869_v4 = vpack.c.bf16 %v1507_v3, %v1507_v3 }
 0x67a   :  { %1285 = vmatprep.mubr.msk.bf16.mxu0 %vm397_vm1, %v869_v4 }
 0x67b   :  { %1075 = vmatmul.mubr.bf16.vlgmr.msra.gmra.mrb[12].mxu0 %v868_v5 }
 0x67c   :  { %1523 = shalt.err (!%p1520_p4)
}
 0x67d   :  { %s1524_s21 = scalar_lea.hbm %s2050_s12, 128 }
 0x67e   :  { %p1525_p5 = scmp.ne.s32.totalorder %s2050_s12, %s1524_s21  ;;  %p1528_p6 = scmp.lt.u32.totalorder %s1524_s21, %s2050_s12 }
 0x680   :  { %p1530_p7 = pnand %p1528_p6, %p1525_p5 }
 0x682   :  { %1533 = shalt.err (!%p1530_p7)
}
 0x683   :  { %1170 = dma.vmem_to_hbm [thread:$0]  %s1168_s1, 128, %s2050_s12, [#allocation5]   ;;  %v1257_v6 = vld [vmem:[%s2048_s10 + $0x7] ss:$8 sm:$0x3] }
 0x684   :  { %v901_v7 = vrot.slane %v1257_v6, %v1789_v54  ;;  %v905_v8 = vrot.slane %v1257_v6, %v1794_v56  ;;  %s1566_s9 = smov [#allocation2]  }
 0x685   :  { %s1157_s27 = sshll.u32 %s1566_s9, 4  ;;  %s1158_s27 = int_to_ptr.vmem [resolvable:$true] %s1157_s27 }
 0x686   :  { %s1534_s10 = scalar_lea.vmem %s1158_s27, 256  ;;  %p1539_p9 = scmp.lt.s32.totalorder %s1158_s27, %s1158_s27 }
 0x687   :  { %p1535_p8 = scmp.ne.s32.totalorder %s1158_s27, %s1534_s10  ;;  %p1540_p10 = scmp.lt.s32.totalorder %s1534_s10, %s1534_s10 }
 0x689   :  { %p1541_p11 = por %p1540_p10, %p1539_p9 }
 0x68b   :  { %p1542_p12 = pnand %p1541_p11, %p1535_p8 }
 0x74e   :  { %v1076_v9 = vpop.f32.mrb[12].mxu0 }
 0x74f   :  { %v1077_v10 = vadd.f32 %v1076_v9, %v901_v7  ;;  %v1078_v11 = vpop.f32.mrb[13].mxu0 }
 0x750   :  { %v1079_v12 = vadd.f32 %v1078_v11, %v905_v8  ;;  %v1080_v13 = vpop.f32.mrb[14].mxu0 }
 0x751   :  { %1508 = vtanh.f32 %v1077_v10  ;;  %v1081_v14 = vpop.f32.mrb[15].mxu0 }
 0x752   :  { %1510 = vtanh.f32 %v1079_v12 }
 0x75b   :  { %v1509_v15 = vpop.eup %1508 }
 0x75c   :  { %v1511_v16 = vpop.eup %1510  ;;  %1085 = vst [vmem:[#allocation2] sm:$0xff] %v1509_v15 }
 0x75d   :  { %1086 = vst [vmem:[#allocation2 + $0x8] sm:$0xff] %v1511_v16 }
 0x75e   :  { %1545 = shalt.err (!%p1542_p12)
}
 0x75f   :  { %s1546_s29 = scalar_lea.hbm %s2049_s11, 256 }
 0x760   :  { %p1547_p13 = scmp.ne.s32.totalorder %s2049_s11, %s1546_s29  ;;  %p1550_p0 = scmp.lt.u32.totalorder %s1546_s29, %s2049_s11 }
 0x762   :  { %p1552_p1 = pnand %p1550_p0, %p1547_p13 }
 0x764   :  { %1555 = shalt.err (!%p1552_p1)
}
 0x765   :  { %1160 = dma.vmem_to_hbm [thread:$0]  %s1158_s27, 256, %s2049_s11, [#allocation3]  }
 0x766   :  { %1556 = dma.done.wait [#allocation3], 256  }
 0x767   :  { %1557 = vsyncadd [#allocation3], 4294967040 }
 0x768   :  { %1558 = dma.done.wait [#allocation5], 128  }
 0x769   :  { %1559 = vsyncadd [#allocation5], 4294967168 }
 0x76a   :  { %1177 = vsyncpa [#allocation3], 1 }
 0x76b   :  { %1178 = vsyncpa [#allocation5], 1 }

</bundles_post_ra>
